<compile_context>
chip_gen: v7x
topology: tpu7x:2x2x1
jax: 0.10.0
libtpu: 0.0.40
codegen_flags: <defaults>
</compile_context>

<pallas_src>
import functools

import numpy as np
import jax
import jax.numpy as jnp
from jax.experimental import pallas as pl
from jax.experimental.pallas import tpu as pltpu

# ----------------------------- configuration --------------------------------
SAMPLE_RATE = 16000
FRAME_LEN = 128          # analysis window (samples) == NFFT here
HOP = 64                 # frame shift (samples); FRAME_LEN == 2 * HOP
NFFT = 128               # power-of-two FFT size
NFREQ = NFFT // 2 + 1    # 65 real frequency bins
NFREQ_PAD = 128          # zero-padded to a lane-friendly width
NMEL = 32                # number of mel bins
NMEL_PAD = 128           # lane-dense output width (sliced in the wrapper)
MAX_FRAMES = 16          # "max_length" of the feature extractor
PREEMPH = 0.97
EPS = float(np.finfo(np.float32).eps)
# AudioSet normalization stats used by bookbot/distil-ast-audioset
AST_MEAN = -4.2677393
AST_STD = 4.5689974
NORM_INV = 1.0 / (2.0 * AST_STD)          # precomputed multiply
NORM_BIAS = -AST_MEAN * NORM_INV          # fused bias


# ------------------------------ Pallas kernel --------------------------------
def fbank_kernel(chunks_ref, dft_ref, mel_ref, out_ref, *, num_valid_frames):
    # chunks_ref: (B*MAX_FRAMES, HOP) raw waveform chunks (row r = chunk r)
    # dft_ref:    (FRAME_LEN, 2*NFREQ_PAD) bf16 fused (dc+preemph+window) real-DFT
    # mel_ref:    (NFREQ_PAD, NMEL_PAD)    bf16 triangular mel bank (0-padded)
    # out_ref:    (B*MAX_FRAMES, NMEL_PAD) f32 normalized log-mel (lane-dense)
    chunks = chunks_ref[...]
    # In-kernel framing: frame f = [chunk f | chunk f+1].  The row that would
    # wrap across a batch boundary is always an invalid (masked) frame, so a
    # zero row is fine as its second half.
    nxt = jnp.concatenate(
        [chunks[1:, :], jnp.zeros((1, HOP), chunks.dtype)], axis=0)
    lo = chunks.astype(jnp.bfloat16)
    hi = nxt.astype(jnp.bfloat16)
    dft = dft_ref[...]
    # Two K=HOP bf16 matmuls against the top/bottom halves of the fused DFT
    # constant == one K=FRAME_LEN matmul over the assembled frame; f32 accum.
    y = (jnp.dot(lo, dft[:HOP, :], preferred_element_type=jnp.float32)
         + jnp.dot(hi, dft[HOP:, :], preferred_element_type=jnp.float32))
    re = y[:, :NFREQ_PAD]                      # static slice at 128-lane boundary
    im = y[:, NFREQ_PAD:]
    power = re * re + im * im                  # |FFT|^2 (f32, VPU)
    mel = jnp.dot(power.astype(jnp.bfloat16), mel_ref[...],
                  preferred_element_type=jnp.float32)
    logmel = jnp.log(jnp.maximum(mel, EPS))    # Kaldi-style log floor (EUP)
    # HF AST zero-pads the fbank to max_length FIRST, then normalizes, so
    # padded rows become (0 - mean) / (2 * std) == NORM_BIAS.  Narrow (R, 1)
    # mask broadcast across lanes.
    rows = jax.lax.broadcasted_iota(jnp.int32, (logmel.shape[0], 1), 0)
    valid = (rows % MAX_FRAMES) < num_valid_frames   # MAX_FRAMES pow2 -> and-mask
    out_ref[...] = jnp.where(valid, logmel * NORM_INV + NORM_BIAS, NORM_BIAS)


# --------------------------- constant construction ---------------------------
@functools.lru_cache(maxsize=1)
def _build_constants():
    # Linear pre-processing operator M = W @ P @ C acting on a frame column:
    #   C: remove DC offset  (I - J/N)
    #   P: pre-emphasis      y[t] = x[t] - 0.97 * x[max(t-1, 0)]
    #   W: hann window       diag(0.5 - 0.5*cos(2*pi*n/(N-1)))
    N = FRAME_LEN
    C = np.eye(N) - np.full((N, N), 1.0 / N)
    P = np.eye(N)
    P[0, 0] -= PREEMPH
    for t in range(1, N):
        P[t, t - 1] -= PREEMPH
    w = 0.5 - 0.5 * np.cos(2.0 * np.pi * np.arange(N) / (N - 1))
    M = np.diag(w) @ P @ C                                    # (N, N)

    # Real-DFT basis, zero-padded from NFREQ -> NFREQ_PAD columns.
    n = np.arange(NFFT)[:, None]
    k = np.arange(NFREQ_PAD)[None, :]
    ang = 2.0 * np.pi * n * k / NFFT
    valid = (k < NFREQ).astype(np.float64)
    cos_mat = np.cos(ang) * valid
    sin_mat = -np.sin(ang) * valid
    # Fold pre-processing into the basis and fuse cos|sin into one matrix.
    dft_comb = M.T @ np.concatenate([cos_mat, sin_mat], axis=1)   # (N, 2*NFREQ_PAD)

    # Kaldi/HTK-style mel filterbank (triangles in mel space), 0-padded to
    # (NFREQ_PAD, NMEL_PAD).
    def mel_scale(f):
        return 1127.0 * np.log(1.0 + f / 700.0)

    low_freq, high_freq = 20.0, SAMPLE_RATE / 2.0
    mel_pts = np.linspace(mel_scale(low_freq), mel_scale(high_freq), NMEL + 2)
    fft_freqs = np.arange(NFREQ) * SAMPLE_RATE / NFFT
    fft_mels = mel_scale(fft_freqs)
    fb = np.zeros((NFREQ_PAD, NMEL_PAD), dtype=np.float64)
    for m in range(NMEL):
        left, center, right = mel_pts[m], mel_pts[m + 1], mel_pts[m + 2]
        up = (fft_mels - left) / (center - left)
        down = (right - fft_mels) / (right - center)
        fb[:NFREQ, m] = np.maximum(0.0, np.minimum(up, down))

    # bf16 constants: halves DMA/VMEM bytes and runs the MXU native bf16 path
    # (f32 accumulation is requested in the kernel dots).
    dft_bf16 = jnp.asarray(dft_comb.astype(np.float32)).astype(jnp.bfloat16)
    mel_bf16 = jnp.asarray(fb.astype(np.float32)).astype(jnp.bfloat16)
    return dft_bf16, mel_bf16


# --------------------------------- wrapper -----------------------------------
@jax.jit
def ast_pipeline(audio):
    """audio: (B, L) float32 waveforms -> (B, MAX_FRAMES, NMEL) float32."""
    B, L = audio.shape
    nf = 1 + (L - FRAME_LEN) // HOP          # snip_edges framing, static
    assert FRAME_LEN == 2 * HOP
    # The in-kernel framing reuses the last chunk row per sample as scratch,
    # so it requires the last frame slot to be padding.
    # TODO(synk): support nf == MAX_FRAMES by passing one extra chunk per sample.
    assert 0 < nf < MAX_FRAMES

    # Pure reshape into HOP-sized chunks: no inflated frames intermediate in
    # HBM and no XLA gather kernel; the frame assembly happens in-kernel.
    pad = (-L) % HOP
    x = jnp.pad(audio.astype(jnp.float32), ((0, 0), (0, pad)))
    nchunks = (L + pad) // HOP
    chunks = x.reshape(B, nchunks, HOP)
    if nchunks < MAX_FRAMES:
        chunks = jnp.pad(chunks, ((0, 0), (0, MAX_FRAMES - nchunks), (0, 0)))
    else:
        chunks = chunks[:, :MAX_FRAMES, :]
    chunks = chunks.reshape(B * MAX_FRAMES, HOP)

    dft_comb, mel_fb = _build_constants()

    R = B * MAX_FRAMES                       # 32 rows: one collapsed grid step
    # At real AST scale: grid over the row axis in 256-multiples, semantics
    # ("parallel",), and keep the dft/mel index_maps returning (0, 0) so the
    # constants stay resident across grid steps.
    out = pl.pallas_call(
        functools.partial(fbank_kernel, num_valid_frames=nf),
        out_shape=jax.ShapeDtypeStruct((R, NMEL_PAD), jnp.float32),
        grid_spec=pltpu.PrefetchScalarGridSpec(
            num_scalar_prefetch=0,
            grid=(1,),
            in_specs=[
                pl.BlockSpec((R, HOP), lambda i: (0, 0)),
                pl.BlockSpec((FRAME_LEN, 2 * NFREQ_PAD), lambda i: (0, 0)),
                pl.BlockSpec((NFREQ_PAD, NMEL_PAD), lambda i: (0, 0)),
            ],
            out_specs=pl.BlockSpec((R, NMEL_PAD), lambda i: (0, 0)),
        ),
        compiler_params=pltpu.CompilerParams(
            dimension_semantics=("arbitrary",)),
    )(chunks, dft_comb, mel_fb)

    # Slice the lane-dense output back to NMEL and restore (B, T, NMEL).
    return out[:, :NMEL].reshape(B, MAX_FRAMES, NMEL)


# TODO(synk): exact Kaldi mel-bank bin edges, dither and energy_floor semantics
# are approximated with a standard HTK triangular filterbank + float32-eps log
# floor (use_energy=False so the htk_compat reorder is a no-op anyway).

if __name__ == "__main__":
    key = jax.random.PRNGKey(0)
    B, L = 2, 1024
    audio = jax.random.normal(key, (B, L), dtype=jnp.float32)

    feats = ast_pipeline(audio)
    jax.block_until_ready(feats)
    assert feats.shape == (B, MAX_FRAMES, NMEL)
    assert feats.dtype == jnp.float32
    print("KERNEL_OK")
</pallas_src>

<mosaic_0001>
module attributes {stable_mosaic.version = 11 : i64} {
  func.func @fbank_kernel(%arg0: i32, %arg1: memref<32x64xf32, #tpu.memory_space<vmem>>, %arg2: memref<128x256xbf16, #tpu.memory_space<vmem>>, %arg3: memref<128x128xbf16, #tpu.memory_space<vmem>>, %arg4: memref<32x128xf32, #tpu.memory_space<vmem>>) attributes {dimension_semantics = [#tpu.dimension_semantics<arbitrary>], iteration_bounds = array<i64: 1>, scalar_prefetch = 0 : i64, scratch_operands = 0 : i64, tpu.core_type = #tpu.core_type<tc>, window_params = [{pipeline_mode = #tpu.pipeline_mode<synchronous>, transform_indices = @transform_0, window_bounds = array<i64: 32, 64>}, {pipeline_mode = #tpu.pipeline_mode<synchronous>, transform_indices = @transform_1, window_bounds = array<i64: 128, 256>}, {pipeline_mode = #tpu.pipeline_mode<synchronous>, transform_indices = @transform_2, window_bounds = array<i64: 128, 128>}, {pipeline_mode = #tpu.pipeline_mode<synchronous>, transform_indices = @transform_3, window_bounds = array<i64: 32, 128>}]} {
    %c0 = arith.constant 0 : index
    %c0_0 = arith.constant 0 : index
    %0 = vector.load %arg1[%c0, %c0_0] : memref<32x64xf32, #tpu.memory_space<vmem>>, vector<32x64xf32>
    %1 = vector.extract_strided_slice %0 {offsets = [1, 0], sizes = [31, 64], strides = [1, 1]} : vector<32x64xf32> to vector<31x64xf32>
    %cst = arith.constant 0.000000e+00 : f32
    %2 = vector.broadcast %cst : f32 to vector<1x64xf32>
    %3 = tpu.concatenate %1, %2 in 0 : vector<31x64xf32>, vector<1x64xf32> -> vector<32x64xf32>
    %4 = arith.truncf %0 : vector<32x64xf32> to vector<32x64xbf16>
    %5 = arith.truncf %3 : vector<32x64xf32> to vector<32x64xbf16>
    %c0_1 = arith.constant 0 : index
    %c0_2 = arith.constant 0 : index
    %6 = vector.load %arg2[%c0_1, %c0_2] : memref<128x256xbf16, #tpu.memory_space<vmem>>, vector<128x256xbf16>
    %7 = vector.extract_strided_slice %6 {offsets = [0, 0], sizes = [64, 256], strides = [1, 1]} : vector<128x256xbf16> to vector<64x256xbf16>
    %cst_3 = arith.constant dense<0.000000e+00> : vector<32x256xf32>
    %8 = tpu.matmul %4, %7, %cst_3 {dimension_numbers = #tpu.dot_dimension_numbers<[1], [0], [0], [1], [0, 0, 1, 1], [], []>} : vector<32x64xbf16>, vector<64x256xbf16>, vector<32x256xf32> -> vector<32x256xf32>
    %9 = vector.extract_strided_slice %6 {offsets = [64, 0], sizes = [64, 256], strides = [1, 1]} : vector<128x256xbf16> to vector<64x256xbf16>
    %cst_4 = arith.constant dense<0.000000e+00> : vector<32x256xf32>
    %10 = tpu.matmul %5, %9, %cst_4 {dimension_numbers = #tpu.dot_dimension_numbers<[1], [0], [0], [1], [0, 0, 1, 1], [], []>} : vector<32x64xbf16>, vector<64x256xbf16>, vector<32x256xf32> -> vector<32x256xf32>
    %11 = arith.addf %8, %10 : vector<32x256xf32>
    %12 = vector.extract_strided_slice %11 {offsets = [0, 0], sizes = [32, 128], strides = [1, 1]} : vector<32x256xf32> to vector<32x128xf32>
    %13 = vector.extract_strided_slice %11 {offsets = [0, 128], sizes = [32, 128], strides = [1, 1]} : vector<32x256xf32> to vector<32x128xf32>
    %14 = arith.mulf %12, %12 : vector<32x128xf32>
    %15 = arith.mulf %13, %13 : vector<32x128xf32>
    %16 = arith.addf %14, %15 : vector<32x128xf32>
    %17 = arith.truncf %16 : vector<32x128xf32> to vector<32x128xbf16>
    %c0_5 = arith.constant 0 : index
    %c0_6 = arith.constant 0 : index
    %18 = vector.load %arg3[%c0_5, %c0_6] : memref<128x128xbf16, #tpu.memory_space<vmem>>, vector<128x128xbf16>
    %cst_7 = arith.constant dense<0.000000e+00> : vector<32x128xf32>
    %19 = tpu.matmul %17, %18, %cst_7 {dimension_numbers = #tpu.dot_dimension_numbers<[1], [0], [0], [1], [0, 0, 1, 1], [], []>} : vector<32x128xbf16>, vector<128x128xbf16>, vector<32x128xf32> -> vector<32x128xf32>
    %cst_8 = arith.constant 1.1920929E-7 : f32
    %20 = vector.broadcast %cst_8 : f32 to vector<32x128xf32>
    %21 = arith.maximumf %19, %20 : vector<32x128xf32>
    %22 = math.log %21 : vector<32x128xf32>
    %23 = tpu.iota {dimensions = array<i32: 0>} : vector<32x1xi32>
    %c16_i32 = arith.constant 16 : i32
    %c0_i32 = arith.constant 0 : i32
    %24 = arith.cmpi eq, %c16_i32, %c0_i32 : i32
    %c1_i32 = arith.constant 1 : i32
    %25 = arith.select %24, %c1_i32, %c16_i32 : i32
    %26 = vector.broadcast %25 : i32 to vector<32x1xi32>
    %27 = arith.remsi %23, %26 : vector<32x1xi32>
    %c0_i32_9 = arith.constant 0 : i32
    %28 = vector.broadcast %c0_i32_9 : i32 to vector<32x1xi32>
    %29 = arith.cmpi ne, %27, %28 : vector<32x1xi32>
    %c0_i32_10 = arith.constant 0 : i32
    %30 = vector.broadcast %c0_i32_10 : i32 to vector<32x1xi32>
    %31 = arith.cmpi slt, %27, %30 : vector<32x1xi32>
    %c0_i32_11 = arith.constant 0 : i32
    %32 = arith.cmpi slt, %25, %c0_i32_11 : i32
    %33 = vector.broadcast %32 : i1 to vector<32x1xi1>
    %34 = vector.broadcast %33 : vector<32x1xi1> to vector<32x1xi1>
    %35 = arith.xori %31, %34 : vector<32x1xi1>
    %36 = arith.andi %35, %29 : vector<32x1xi1>
    %37 = vector.broadcast %25 : i32 to vector<32x1xi32>
    %38 = arith.addi %27, %37 : vector<32x1xi32>
    %39 = arith.select %36, %38, %27 : vector<32x1xi1>, vector<32x1xi32>
    %c15_i32 = arith.constant 15 : i32
    %40 = vector.broadcast %c15_i32 : i32 to vector<32x1xi32>
    %41 = arith.cmpi slt, %39, %40 : vector<32x1xi32>
    %cst_12 = arith.constant 0.109433196 : f32
    %42 = vector.broadcast %cst_12 : f32 to vector<32x128xf32>
    %43 = arith.mulf %22, %42 : vector<32x128xf32>
    %cst_13 = arith.constant 0.467032373 : f32
    %44 = vector.broadcast %cst_13 : f32 to vector<32x128xf32>
    %45 = arith.addf %43, %44 : vector<32x128xf32>
    %cst_14 = arith.constant 0.467032373 : f32
    %46 = vector.shape_cast %41 : vector<32x1xi1> to vector<32x1xi1>
    %47 = vector.broadcast %46 : vector<32x1xi1> to vector<32x128xi1>
    %48 = vector.broadcast %cst_14 : f32 to vector<32x128xf32>
    %49 = arith.select %47, %45, %48 : vector<32x128xi1>, vector<32x128xf32>
    %c0_15 = arith.constant 0 : index
    %c0_16 = arith.constant 0 : index
    %50 = vector.load %arg4[%c0_15, %c0_16] : memref<32x128xf32, #tpu.memory_space<vmem>>, vector<32x128xf32>
    tpu.vector_store %arg4[%c0_15, %c0_16], %49 {strides = array<i32>} : memref<32x128xf32, #tpu.memory_space<vmem>>, vector<32x128xf32>,
    return
  }
  func.func @transform_0(%arg0: i32) -> (i32, i32) {
    %c0_i32 = arith.constant 0 : i32
    %c0_i32_0 = arith.constant 0 : i32
    %c0_i32_1 = arith.constant 0 : i32
    return %c0_i32, %c0_i32_0 : i32, i32
  }
  func.func @transform_1(%arg0: i32) -> (i32, i32) {
    %c0_i32 = arith.constant 0 : i32
    %c0_i32_0 = arith.constant 0 : i32
    %c0_i32_1 = arith.constant 0 : i32
    return %c0_i32, %c0_i32_0 : i32, i32
  }
  func.func @transform_2(%arg0: i32) -> (i32, i32) {
    %c0_i32 = arith.constant 0 : i32
    %c0_i32_0 = arith.constant 0 : i32
    %c0_i32_1 = arith.constant 0 : i32
    return %c0_i32, %c0_i32_0 : i32, i32
  }
  func.func @transform_3(%arg0: i32) -> (i32, i32) {
    %c0_i32 = arith.constant 0 : i32
    %c0_i32_0 = arith.constant 0 : i32
    %c0_i32_1 = arith.constant 0 : i32
    return %c0_i32, %c0_i32_0 : i32, i32
  }
}

</mosaic_0001>

<bundles_post_ra>
// kernel: ast_pipeline.1
= control target key start
LH: loop header
LB: loop body
LE: loop exit
PB: predicated region body
PF: predicated region fallthrough
CT: control target
= control target key end

     0   :  { %v626_v2 = vmov 0   ;;  %vm24_vm0 = vcmask 1046528   ;;  %vm97_vm1 = vcmask 523264   ;;  %s758_s0 = inlined_call_operand.vmem [shape: f32[32,64], index: 0, kind: input, shape index: {}]   ;;  %s759_s1 = inlined_call_operand.vmem [shape: bf16[128,256], index: 1, kind: input, shape index: {}]   ;;  %s760_s2 = inlined_call_operand.vmem [shape: bf16[128,128], index: 2, kind: input, shape index: {}]   ;;  %s761_s3 = inlined_call_operand.hbm [shape: f32[32,128], index: 3, kind: output, shape index: {}]  }
   0x1   :  { %v562_v0 = vld [vmem:[%s759_s1 + $0x44] ss:$8 sps:$4 sm:$0xff]   ;;  %v564_v1 = vld [vmem:[%s759_s1 + $0x40] ss:$8 sps:$4 sm:$0xff]   ;;  %136 = vmatprep.mubr.bf16.mxu0 %v626_v2  ;;  %v565_v3 = vld [vmem:[%s759_s1 + $0x54] ss:$8 sps:$4 sm:$0xff]  }
   0x2   :  { %104 = vmatprep.subr.bf16.mxu0 %v562_v0  ;;  %v567_v4 = vld [vmem:[%s759_s1 + $0x50] ss:$8 sps:$4 sm:$0xff]   ;;  %v568_v5 = vld [vmem:[%s759_s1 + $0x64] ss:$8 sps:$4 sm:$0xff]   ;;  %v570_v9 = vld [vmem:[%s759_s1 + $0x60] ss:$8 sps:$4 sm:$0xff]  }
   0x3   :  { %105 = vmatpush1.bf16.msra.mxu0 %v564_v1  ;;  %v16_v6 = vld [vmem:[%s758_s0] sm:$0xff]  ;;  %v17_v7 = vld [vmem:[%s758_s0 + $0x8] sm:$0xff]  ;;  %v18_v8 = vld [vmem:[%s758_s0 + $0x10] sm:$0xff] }
   0x4   :  { %106 = vmatprep.subr.bf16.mxu0 %v565_v3  ;;  %v25_v10 = vrot.slane %v16_v6, 1  ;;  %v26_v11 = vrot.slane %v17_v7, 1  ;;  %v28_v12 = vrot.slane %v18_v8, 1  ;;  %v571_v13 = vld [vmem:[%s759_s1 + $0x74] ss:$8 sps:$4 sm:$0xff]   ;;  %v586_v19 = vld [vmem:[%s760_s2] sm:$0xff]  }
   0x5   :  { %v573_v14 = vld [vmem:[%s759_s1 + $0x70] ss:$8 sps:$4 sm:$0xff]   ;;  %v576_v17 = vld [vmem:[%s759_s1 + $0x4] ss:$8 sps:$4 sm:$0xff]   ;;  %v574_v20 = vld [vmem:[%s759_s1] ss:$8 sps:$4 sm:$0xff]   ;;  %530 = vmatprep.subr.bf16.mxu1 %v586_v19 }
   0x6   :  { %v27_v15 = vsel %vm24_vm0, %v25_v10, %v26_v11  ;;  %v29_v16 = vsel %vm24_vm0, %v26_v11, %v28_v12  ;;  %v19_v18 = vld [vmem:[%s758_s0 + $0x18] sm:$0xff]  ;;  %v587_v21 = vld [vmem:[%s760_s2 + $0x8] sm:$0xff]   ;;  %531 = vmatpush3.bf16.msra.mxu1 %v586_v19  ;;  %v588_v25 = vld [vmem:[%s760_s2 + $0x10] sm:$0xff]  }
   0x7   :  { %107 = vmatpush1.bf16.msra.mxu0 %v567_v4  ;;  %v39_v22 = vpack.c.bf16 %v29_v16, %v27_v15  ;;  %v579_v23 = vld [vmem:[%s759_s1 + $0x14] ss:$8 sps:$4 sm:$0xff]   ;;  %v30_v24 = vrot.slane %v19_v18, 1  ;;  %532 = vmatprep.subr.bf16.mxu1 %v587_v21 }
   0x8   :  { %108 = vmatprep.subr.bf16.mxu0 %v568_v5 }
   0xb   :  { %109 = vmatpush1.bf16.msra.mxu0 %v570_v9 }
   0xc   :  { %110 = vmatprep.subr.bf16.mxu0 %v571_v13 }
   0xf   :  { %111 = vmatpush1.bf16.msra.mxu0 %v573_v14 }
  0x10   :  { %203 = vmatprep.subr.bf16.mxu0 %v576_v17 }
  0x12   :  { %500 = vmatmul.mubr.msk.bf16.vlgmr.msra.gmra.mrb[0].mxu0 %vm97_vm1, %v39_v22 }
  0x13   :  { %8 = vsyncpa [#allocation3], 0  ;;  %204 = vmatpush1.bf16.msra.mxu0 %v574_v20  ;;  %v577_v26 = vld [vmem:[%s759_s1 + $0x10] ss:$8 sps:$4 sm:$0xff]   ;;  %146 = vmatprep.mubr.bf16.mxu0 %v626_v2  ;;  %v31_v27 = vsel %vm24_vm0, %v28_v12, %v30_v24  ;;  %v36_v28 = vsel %vm24_vm0, %v30_v24, 0.0  ;;  %v37_v35 = vpack.c.bf16 %v17_v7, %v16_v6  ;;  %v38_v36 = vpack.c.bf16 %v19_v18, %v18_v8  ;;  %v590_v37 = vld [vmem:[%s760_s2 + $0x20] sm:$0xff]  }
  0x14   :  { %205 = vmatprep.subr.bf16.mxu0 %v579_v23  ;;  %v582_v29 = vld [vmem:[%s759_s1 + $0x24] ss:$8 sps:$4 sm:$0xff]   ;;  %533 = vmatpush3.bf16.msra.mxu1 %v587_v21  ;;  %v589_v30 = vld [vmem:[%s760_s2 + $0x18] sm:$0xff]   ;;  %v40_v31 = vpack.c.bf16 %v36_v28, %v31_v27  ;;  %v580_v32 = vld [vmem:[%s759_s1 + $0x20] ss:$8 sps:$4 sm:$0xff]   ;;  %v395_v5 = vlaneseq }
  0x15   :  { %534 = vmatprep.subr.bf16.mxu1 %v588_v25  ;;  %v585_v33 = vld [vmem:[%s759_s1 + $0x34] ss:$8 sps:$4 sm:$0xff]   ;;  %v583_v34 = vld [vmem:[%s759_s1 + $0x30] ss:$8 sps:$4 sm:$0xff]   ;;  %v591_v38 = vld [vmem:[%s760_s2 + $0x28] sm:$0xff]  }
  0x16   :  { %v592_v39 = vld [vmem:[%s760_s2 + $0x30] sm:$0xff]   ;;  %v593_v40 = vld [vmem:[%s760_s2 + $0x38] sm:$0xff]   ;;  %v396_v8 = vshrl.u32 %v395_v5, 7  ;;  %s627_s2 = smov [#allocation2]  }
  0x17   :  { %206 = vmatpush1.bf16.msra.mxu0 %v577_v26  ;;  %s481_s12 = sshll.u32 %s627_s2, 4  ;;  %s482_s12 = int_to_ptr.vmem [resolvable:$true] %s481_s12 }
  0x18   :  { %207 = vmatprep.subr.bf16.mxu0 %v582_v29  ;;  %535 = vmatpush3.bf16.msra.mxu1 %v588_v25  ;;  %v399_v9 = vadd.s32 24, %v396_v8  ;;  %v397_v10 = vadd.s32 8, %v396_v8  ;;  %s602_s13 = scalar_lea.vmem %s482_s12, 512  ;;  %p607_p1 = scmp.lt.s32.totalorder %s482_s12, %s482_s12 }
  0x19   :  { %536 = vmatprep.subr.bf16.mxu1 %v589_v30  ;;  %p603_p0 = scmp.ne.s32.totalorder %s482_s12, %s602_s13  ;;  %p608_p2 = scmp.lt.s32.totalorder %s602_s13, %s602_s13 }
  0x1a   :  { %501 = vmatmul.mubr.msk.bf16.gmra.mrb[4].mxu0 %vm97_vm1, %v40_v31  ;;  %v425_v16 = vand.u32 15, %v399_v9  ;;  %v411_v20 = vand.u32 15, %v397_v10 }
  0x1b   :  { %208 = vmatpush1.bf16.msra.mxu0 %v580_v32  ;;  %235 = vmatprep.mubr.bf16.mxu0 %v626_v2  ;;  %p609_p3 = por %p608_p2, %p607_p1 }
  0x1c   :  { %209 = vmatprep.subr.bf16.mxu0 %v585_v33  ;;  %537 = vmatpush3.bf16.msra.mxu1 %v589_v30  ;;  %vm451_vm2 = vcmp.lt.s32.totalorder %v425_v16, 15  ;;  %vm449_vm3 = vcmp.lt.s32.totalorder %v411_v20, 15 }
  0x1d   :  { %538 = vmatprep.subr.bf16.mxu1 %v590_v37  ;;  %p610_p4 = pnand %p609_p3, %p603_p0 }
  0x1f   :  { %210 = vmatpush1.bf16.msra.mxu0 %v583_v34 }
  0x20   :  { %539 = vmatpush3.bf16.msra.mxu1 %v590_v37 }
  0x21   :  { %540 = vmatprep.subr.bf16.mxu1 %v591_v38 }
  0x22   :  { %510 = vmatmul.mubr.msk.bf16.vlgmr.msra.gmra.mrb[0].mxu0 %vm97_vm1, %v37_v35 }
  0x23   :  { %245 = vmatprep.mubr.bf16.mxu0 %v626_v2 }
  0x24   :  { %541 = vmatpush3.bf16.msra.mxu1 %v591_v38 }
  0x25   :  { %542 = vmatprep.subr.bf16.mxu1 %v592_v39 }
  0x28   :  { %543 = vmatpush3.bf16.msra.mxu1 %v592_v39 }
  0x29   :  { %544 = vmatprep.subr.bf16.mxu1 %v593_v40 }
  0x2a   :  { %511 = vmatmul.mubr.msk.bf16.gmra.mrb[4].mxu0 %vm97_vm1, %v38_v36 }
  0x2c   :  { %545 = vmatpush3.bf16.msra.mxu1 %v593_v40 }
  0xf5   :  { %v237_v41 = vpop.f32.mrb[0].mxu0 }
  0xf6   :  { %v256_v42 = vmul.f32 %v237_v41, %v237_v41  ;;  %v239_v43 = vpop.f32.mrb[1].mxu0 }
  0xf7   :  { %v260_v44 = vmul.f32 %v239_v43, %v239_v43  ;;  %v241_v45 = vpop.f32.mrb[2].mxu0 }
  0xf8   :  { %v257_v46 = vmul.f32 %v241_v45, %v241_v45  ;;  %v243_v47 = vpop.f32.mrb[3].mxu0 }
  0xf9   :  { %v261_v48 = vmul.f32 %v243_v47, %v243_v47  ;;  %v264_v49 = vadd.f32 %v260_v44, %v256_v42 }
  0xfb   :  { %v265_v50 = vadd.f32 %v261_v48, %v257_v46 }
  0xfd   :  { %v247_v51 = vpop.f32.mrb[4].mxu0  ;;  %v268_v52 = vpack.c.bf16 %v265_v50, %v264_v49 }
  0xfe   :  { %v258_v53 = vmul.f32 %v247_v51, %v247_v51  ;;  %v249_v54 = vpop.f32.mrb[5].mxu0 }
  0xff   :  { %v262_v55 = vmul.f32 %v249_v54, %v249_v54  ;;  %v251_v56 = vpop.f32.mrb[6].mxu0  ;;  %546 = vmatprep.mubr.bf16.mxu1 %v268_v52 }
 0x100   :  { %v259_v57 = vmul.f32 %v251_v56, %v251_v56  ;;  %v253_v58 = vpop.f32.mrb[7].mxu0 }
 0x101   :  { %v266_v59 = vadd.f32 %v262_v55, %v258_v53  ;;  %v263_v60 = vmul.f32 %v253_v58, %v253_v58 }
 0x103   :  { %v267_v61 = vadd.f32 %v263_v60, %v259_v57 }
 0x105   :  { %v269_v62 = vpack.c.bf16 %v267_v61, %v266_v59 }
 0x107   :  { %547 = vmatmul.mubr.bf16.vlgmr.msra.gmra.mrb[0].mxu1 %v269_v62 }
 0x1da   :  { %v548_v63 = vpop.f32.mrb[0].mxu1 }
 0x1db   :  { %v385_v0 = vmax.f32 %v548_v63, 1.1920929e-07  ;;  %v368_v1 = vpop.f32.mrb[1].mxu1 }
 0x1dc   :  { %v383_v2 = vmax.f32 %v368_v1, 1.1920929e-07  ;;  %v549_v3 = vpop.f32.mrb[2].mxu1 }
 0x1dd   :  { %594 = vlog2.f32 %v385_v0  ;;  %v386_v4 = vmax.f32 %v549_v3, 1.1920929e-07  ;;  %v371_v6 = vpop.f32.mrb[3].mxu1 }
 0x1de   :  { %596 = vlog2.f32 %v383_v2  ;;  %v384_v7 = vmax.f32 %v371_v6, 1.1920929e-07 }
 0x1df   :  { %598 = vlog2.f32 %v386_v4 }
 0x1e0   :  { %600 = vlog2.f32 %v384_v7 }
 0x1e7   :  { %v595_v11 = vpop.eup %594 }
 0x1e8   :  { %v597_v12 = vpop.eup %596  ;;  %v392_v13 = vmul.f32 0.6931472, %v595_v11 }
 0x1e9   :  { %v599_v14 = vpop.eup %598  ;;  %v388_v15 = vmul.f32 0.6931472, %v597_v12 }
 0x1ea   :  { %v601_v17 = vpop.eup %600  ;;  %v454_v18 = vmul.f32 0.1094332, %v392_v13  ;;  %v394_v19 = vmul.f32 0.6931472, %v599_v14 }
 0x1eb   :  { %v452_v21 = vmul.f32 0.1094332, %v388_v15  ;;  %v390_v22 = vmul.f32 0.6931472, %v601_v17 }
 0x1ec   :  { %v458_v23 = vadd.f32 0.46703237, %v454_v18  ;;  %v455_v24 = vmul.f32 0.1094332, %v394_v19 }
 0x1ed   :  { %v456_v25 = vadd.f32 0.46703237, %v452_v21  ;;  %v453_v26 = vmul.f32 0.1094332, %v390_v22 }
 0x1ee   :  { %474 = vst [vmem:[#allocation2 + $0x10] sm:$0xff] %v458_v23  ;;  %v459_v27 = vadd.f32 0.46703237, %v455_v24 }
 0x1ef   :  { %472 = vst [vmem:[#allocation2] sm:$0xff] %v456_v25  ;;  %v457_v28 = vadd.f32 0.46703237, %v453_v26 }
 0x1f0   :  { %v471_v29 = vsel %vm451_vm2, %v459_v27, 0.46703237 }
 0x1f1   :  { %475 = vst [vmem:[#allocation2 + $0x18] sm:$0xff] %v471_v29  ;;  %v469_v30 = vsel %vm449_vm3, %v457_v28, 0.46703237 }
 0x1f2   :  { %473 = vst [vmem:[#allocation2 + $0x8] sm:$0xff] %v469_v30 }
 0x1f3   :  { %613 = shalt.err (!%p610_p4)
}
 0x1f4   :  { %s614_s16 = scalar_lea.hbm %s761_s3, 512 }
 0x1f5   :  { %p615_p5 = scmp.ne.s32.totalorder %s761_s3, %s614_s16  ;;  %p618_p6 = scmp.lt.u32.totalorder %s614_s16, %s761_s3 }
 0x1f7   :  { %p620_p7 = pnand %p618_p6, %p615_p5 }
 0x1f9   :  { %623 = shalt.err (!%p620_p7)
}
 0x1fa   :  { %s628_s20 = smov 128   ;;  %s629_s21 = smov 8  }
 0x1fb   :  { %487 = dma.vmem_to_hbm [thread:$0]  %s482_s12, 512, %s761_s3, [#allocation3], %s628_s20, %s628_s20, %s629_s21  }
 0x1fc   :  { %624 = dma.done.wait [#allocation3], 512  }
 0x1fd   :  { %625 = vsyncadd [#allocation3], 4294966784 }
 0x1fe   :  { %491 = vsyncpa [#allocation3], 1 }

</bundles_post_ra>
